<compile_context>
chip_gen: v7x
topology: tpu7x:2x2x1
jax: 0.10.0
libtpu: 0.0.40
codegen_flags: <defaults>
</compile_context>

<pallas_src>
import jax
import jax.numpy as jnp
from jax import lax
from jax.experimental import pallas as pl
from jax.experimental.pallas import tpu as pltpu


_LANES = 128
_SUBLANES = 8
# Double-buffered pipeline-input budget per fused call (all heads of the group are staged each
# grid step).  16 MiB of input buffers + the tiny resident output slab stays well inside the
# 32 MiB scoped limit requested below (v5e/v6e: 128 MiB physical VMEM, v7x: 64 MiB physical).
_INPUT_VMEM_BUDGET = 16 * 1024 * 1024
_VMEM_LIMIT_BYTES = 32 * 1024 * 1024
_N_CORE_SPLITS = 2  # leading "parallel" grid axis -> uses both TensorCores on v7x


def _cdiv(a, b):
    return (a + b - 1) // b


def _round_up(x, m):
    return (x + m - 1) // m * m


def _make_group_kernel(n_heads, row_tile, n_rows, ragged, has_skip):
    """Fused kernel: for each head h, accumulate sum((x_h - t_h)^2) into out[h] (8, 128)."""

    def kernel(*refs):
        in_refs, out_ref = refs[:-1], refs[-1]
        k = pl.program_id(1)  # row-tile (reduction) axis
        row_start = (pl.program_id(0) * pl.num_programs(1) + k) * row_tile

        @pl.when(k == 0)
        def _init():
            out_ref[...] = jnp.zeros_like(out_ref)

        def accumulate(apply_mask):
            # Static Python loop over heads: every head's tile is resident this grid step.
            for h in range(n_heads):
                x = in_refs[2 * h][...].astype(jnp.float32)
                t = in_refs[2 * h + 1][...].astype(jnp.float32)
                sq = (x - t) * (x - t)
                if apply_mask:
                    rows = row_start + lax.broadcasted_iota(jnp.int32, sq.shape, 0)
                    sq = jnp.where(rows < n_rows, sq, 0.0)
                # Fold (row_tile, 128) into the resident (8, 128) accumulator with plain VALU
                # adds; the cross-lane collapse happens in JAX on the tiny output slab.
                out_ref[h] += jnp.sum(
                    sq.reshape(row_tile // _SUBLANES, _SUBLANES, _LANES), axis=0)

        if not (ragged or has_skip):
            # Perfectly tiled: no mask, no gating -- pure sub/mul/add on every tile.
            accumulate(False)
        else:
            is_full = row_start + row_tile <= n_rows

            @pl.when(is_full)
            def _full_tiles():          # all interior tiles: unmasked accumulate
                accumulate(False)

            if ragged:
                @pl.when(jnp.logical_and(row_start < n_rows, jnp.logical_not(is_full)))
                def _edge_tile():       # the single ragged edge tile: masked accumulate
                    accumulate(True)
            # Tiles with row_start >= n_rows (core-split padding) match neither branch
            # and are skipped (their clamped DMA re-reads a valid block but is never used).

    return kernel


def _fused_group_sq_sums(fields, targets):
    """One pallas_call producing sum((f_h - t_h)^2) for every head in a same-shape group."""
    g = len(fields)
    m = int(fields[0].size)
    f_item = fields[0].dtype.itemsize
    t_item = targets[0].dtype.itemsize

    # Lane-dense (r, 128) views; zero-pad the flat tail when m is not a multiple of 128
    # (both field and target are padded with zeros, so padded lanes contribute exactly 0).
    r = _cdiv(m, _LANES)

    def as_rows(a):
        flat = a.reshape(-1)
        pad = r * _LANES - m
        if pad:
            flat = jnp.pad(flat, (0, pad))
        return flat.reshape(r, _LANES)

    operands = []
    for f, t in zip(fields, targets):
        operands.append(as_rows(f))
        operands.append(as_rows(t))

    # Row-tile size: as large as the input budget allows (all heads staged per step, double
    # buffered), rounded to the packed-sublane multiple of the narrowest dtype, capped at the
    # (rounded-up) row count.
    sub_mult = max(_SUBLANES * (4 // f_item), _SUBLANES * (4 // t_item))
    bytes_per_row = g * _LANES * (f_item + t_item) * 2  # field + target, double-buffered
    row_tile = max(sub_mult,
                   _INPUT_VMEM_BUDGET // bytes_per_row // sub_mult * sub_mult)
    row_tile = min(row_tile, _round_up(r, sub_mult))

    n_tiles = _cdiv(r, row_tile)
    n_cores = min(_N_CORE_SPLITS, n_tiles)
    tiles_per_core = _cdiv(n_tiles, n_cores)
    ragged = (r % row_tile) != 0
    has_skip = n_cores * tiles_per_core > n_tiles

    def in_map(c, k):
        gt = c * tiles_per_core + k
        # Clamp so core-split padding steps never issue an out-of-range block DMA.
        return (jnp.minimum(gt, n_tiles - 1), 0)

    in_specs = [pl.BlockSpec((row_tile, _LANES), in_map) for _ in operands]

    bytes_accessed = (sum(int(a.size) * a.dtype.itemsize for a in operands)
                      + n_cores * g * _SUBLANES * _LANES * 4)
    cost = pl.CostEstimate(flops=3 * g * r * _LANES, transcendentals=0,
                           bytes_accessed=bytes_accessed)

    out = pl.pallas_call(
        _make_group_kernel(g, row_tile, r, ragged, has_skip),
        out_shape=jax.ShapeDtypeStruct((n_cores, g, _SUBLANES, _LANES), jnp.float32),
        grid=(n_cores, tiles_per_core),
        in_specs=in_specs,
        out_specs=pl.BlockSpec((None, g, _SUBLANES, _LANES), lambda c, k: (c, 0, 0, 0)),
        compiler_params=pltpu.CompilerParams(
            dimension_semantics=("parallel", "arbitrary"),
            vmem_limit_bytes=_VMEM_LIMIT_BYTES),
        cost_estimate=cost,
    )(*operands)

    # Collapse the per-core lane-dense partial slabs to one scalar per head (tiny, in JAX).
    return jnp.sum(out, axis=(0, 2, 3))  # (g,)


def multi_head_loss_autotune(head_fields, head_targets, lambdas, log_sigmas):
    """head_fields / head_targets: lists of per-head arrays (e.g. (B, C, H, W))."""
    n = len(head_fields)
    assert n == len(head_targets) == lambdas.shape[0] == log_sigmas.shape[0]

    # Group heads by (shape, dtype); each group is one fused pallas_call (no per-head launches).
    groups = {}
    for i, (f, t) in enumerate(zip(head_fields, head_targets)):
        key = (tuple(f.shape), f.dtype.name, tuple(t.shape), t.dtype.name)
        groups.setdefault(key, []).append(i)

    head_losses_list = [None] * n
    for idxs in groups.values():
        sums = _fused_group_sq_sums([head_fields[i] for i in idxs],
                                    [head_targets[i] for i in idxs])
        for j, i in enumerate(idxs):
            head_losses_list[i] = sums[j] / float(head_fields[i].size)
    head_losses = jnp.stack(head_losses_list)

    # Kendall-Gal-Cipolla auto-tuned weighting: O(n) scalar math, cheapest in plain JAX.
    lam = lambdas.astype(jnp.float32)
    ls = log_sigmas.astype(jnp.float32)
    total = jnp.sum(lam * head_losses / (2.0 * jnp.exp(ls) ** 2)) + jnp.sum(lam * ls)
    return total, head_losses


def _reference(head_fields, head_targets, lambdas, log_sigmas):
    hl = jnp.stack([jnp.mean((f.astype(jnp.float32) - t.astype(jnp.float32)) ** 2)
                    for f, t in zip(head_fields, head_targets)])
    loss_values = lambdas * hl / (2.0 * jnp.exp(log_sigmas) ** 2)
    auto_reg = lambdas * log_sigmas
    return jnp.sum(loss_values) + jnp.sum(auto_reg), hl


if __name__ == "__main__":
    key = jax.random.PRNGKey(0)
    n_heads = 4
    B, C, H, W = 2, 4, 16, 16  # NCHW per head

    keys = jax.random.split(key, 2 * n_heads)
    head_fields = [jax.random.normal(keys[i], (B, C, H, W), dtype=jnp.float32)
                   for i in range(n_heads)]
    head_targets = [jax.random.normal(keys[n_heads + i], (B, C, H, W), dtype=jnp.float32)
                    for i in range(n_heads)]

    # parameters: log_sigmas initialized to zeros per the module's __init__; lambdas fixed.
    lambdas = jnp.array([1.0, 1.0, 0.5, 1.0], dtype=jnp.float32)
    log_sigmas = jnp.zeros((n_heads,), dtype=jnp.float32)

    fn = jax.jit(multi_head_loss_autotune)
    total, head_losses = fn(head_fields, head_targets, lambdas, log_sigmas)
    total = jax.block_until_ready(total)
    head_losses = jax.block_until_ready(head_losses)

    ref_total, ref_hl = _reference(head_fields, head_targets, lambdas, log_sigmas)
    assert jnp.allclose(total, ref_total, rtol=1e-5, atol=1e-5), (total, ref_total)
    assert jnp.allclose(head_losses, ref_hl, rtol=1e-5, atol=1e-5), (head_losses, ref_hl)

    print("KERNEL_OK")
</pallas_src>

<mosaic_0001>
module attributes {stable_mosaic.version = 11 : i64} {
  func.func @kernel(%arg0: i32, %arg1: i32, %arg2: memref<16x128xf32, #tpu.memory_space<vmem>>, %arg3: memref<16x128xf32, #tpu.memory_space<vmem>>, %arg4: memref<16x128xf32, #tpu.memory_space<vmem>>, %arg5: memref<16x128xf32, #tpu.memory_space<vmem>>, %arg6: memref<16x128xf32, #tpu.memory_space<vmem>>, %arg7: memref<16x128xf32, #tpu.memory_space<vmem>>, %arg8: memref<16x128xf32, #tpu.memory_space<vmem>>, %arg9: memref<16x128xf32, #tpu.memory_space<vmem>>, %arg10: memref<1x4x8x128xf32, #tpu.memory_space<vmem>>) attributes {dimension_semantics = [#tpu.dimension_semantics<parallel>, #tpu.dimension_semantics<arbitrary>], iteration_bounds = array<i64: 1, 1>, scalar_prefetch = 0 : i64, scratch_operands = 0 : i64, tpu.core_type = #tpu.core_type<tc>, window_params = [{transform_indices = @transform_0, window_bounds = array<i64: 16, 128>}, {transform_indices = @transform_1, window_bounds = array<i64: 16, 128>}, {transform_indices = @transform_2, window_bounds = array<i64: 16, 128>}, {transform_indices = @transform_3, window_bounds = array<i64: 16, 128>}, {transform_indices = @transform_4, window_bounds = array<i64: 16, 128>}, {transform_indices = @transform_5, window_bounds = array<i64: 16, 128>}, {transform_indices = @transform_6, window_bounds = array<i64: 16, 128>}, {transform_indices = @transform_7, window_bounds = array<i64: 16, 128>}, {transform_indices = @transform_8, window_bounds = array<i64: 1, 4, 8, 128>}]} {
    %c0_i32 = arith.constant 0 : i32
    %0 = arith.cmpi eq, %arg1, %c0_i32 : i32
    %1 = arith.extui %0 : i1 to i32
    %c0_i32_0 = arith.constant 0 : i32
    %2 = arith.cmpi ne, %1, %c0_i32_0 : i32
    scf.if %2 {
      %cst_48 = arith.constant 0.000000e+00 : f32
      %55 = vector.broadcast %cst_48 : f32 to vector<4x8x128xf32>
      %c0_49 = arith.constant 0 : index
      %c0_50 = arith.constant 0 : index
      %c0_51 = arith.constant 0 : index
      %c0_52 = arith.constant 0 : index
      %56 = vector.load %arg10[%c0_49, %c0_50, %c0_51, %c0_52] : memref<1x4x8x128xf32, #tpu.memory_space<vmem>>, vector<1x4x8x128xf32>
      %57 = vector.shape_cast %56 : vector<1x4x8x128xf32> to vector<4x8x128xf32>
      %58 = vector.shape_cast %55 : vector<4x8x128xf32> to vector<1x4x8x128xf32>
      tpu.vector_store %arg10[%c0_49, %c0_50, %c0_51, %c0_52], %58 {strides = array<i32>} : memref<1x4x8x128xf32, #tpu.memory_space<vmem>>, vector<1x4x8x128xf32>,
    } else {
    }
    %c0 = arith.constant 0 : index
    %c0_1 = arith.constant 0 : index
    %3 = vector.load %arg2[%c0, %c0_1] : memref<16x128xf32, #tpu.memory_space<vmem>>, vector<16x128xf32>
    %c0_2 = arith.constant 0 : index
    %c0_3 = arith.constant 0 : index
    %4 = vector.load %arg3[%c0_2, %c0_3] : memref<16x128xf32, #tpu.memory_space<vmem>>, vector<16x128xf32>
    %5 = arith.subf %3, %4 : vector<16x128xf32>
    %6 = arith.subf %3, %4 : vector<16x128xf32>
    %7 = arith.mulf %5, %6 : vector<16x128xf32>
    %c0_4 = arith.constant 0 : index
    %c0_5 = arith.constant 0 : index
    %c0_6 = arith.constant 0 : index
    %c0_7 = arith.constant 0 : index
    %8 = vector.load %arg10[%c0_4, %c0_5, %c0_6, %c0_7] : memref<1x4x8x128xf32, #tpu.memory_space<vmem>>, vector<1x1x8x128xf32>
    %9 = vector.shape_cast %8 : vector<1x1x8x128xf32> to vector<8x128xf32>
    %10 = vector.shape_cast %7 : vector<16x128xf32> to vector<2x8x128xf32>
    %cst = arith.constant dense<0.000000e+00> : vector<8x128xf32>
    %11 = vector.multi_reduction <add>, %10, %cst [0] : vector<2x8x128xf32> to vector<8x128xf32>
    %12 = arith.addf %9, %11 : vector<8x128xf32>
    %c0_8 = arith.constant 0 : index
    %c0_9 = arith.constant 0 : index
    %c0_10 = arith.constant 0 : index
    %c0_11 = arith.constant 0 : index
    %13 = vector.load %arg10[%c0_8, %c0_9, %c0_10, %c0_11] : memref<1x4x8x128xf32, #tpu.memory_space<vmem>>, vector<1x1x8x128xf32>
    %14 = vector.shape_cast %13 : vector<1x1x8x128xf32> to vector<8x128xf32>
    %15 = vector.shape_cast %12 : vector<8x128xf32> to vector<1x1x8x128xf32>
    tpu.vector_store %arg10[%c0_8, %c0_9, %c0_10, %c0_11], %15 {strides = array<i32>} : memref<1x4x8x128xf32, #tpu.memory_space<vmem>>, vector<1x1x8x128xf32>,
    %c0_12 = arith.constant 0 : index
    %c0_13 = arith.constant 0 : index
    %16 = vector.load %arg4[%c0_12, %c0_13] : memref<16x128xf32, #tpu.memory_space<vmem>>, vector<16x128xf32>
    %c0_14 = arith.constant 0 : index
    %c0_15 = arith.constant 0 : index
    %17 = vector.load %arg5[%c0_14, %c0_15] : memref<16x128xf32, #tpu.memory_space<vmem>>, vector<16x128xf32>
    %18 = arith.subf %16, %17 : vector<16x128xf32>
    %19 = arith.subf %16, %17 : vector<16x128xf32>
    %20 = arith.mulf %18, %19 : vector<16x128xf32>
    %c0_16 = arith.constant 0 : index
    %c1 = arith.constant 1 : index
    %c0_17 = arith.constant 0 : index
    %c0_18 = arith.constant 0 : index
    %21 = vector.load %arg10[%c0_16, %c1, %c0_17, %c0_18] : memref<1x4x8x128xf32, #tpu.memory_space<vmem>>, vector<1x1x8x128xf32>
    %22 = vector.shape_cast %21 : vector<1x1x8x128xf32> to vector<8x128xf32>
    %23 = vector.shape_cast %20 : vector<16x128xf32> to vector<2x8x128xf32>
    %cst_19 = arith.constant dense<0.000000e+00> : vector<8x128xf32>
    %24 = vector.multi_reduction <add>, %23, %cst_19 [0] : vector<2x8x128xf32> to vector<8x128xf32>
    %25 = arith.addf %22, %24 : vector<8x128xf32>
    %c0_20 = arith.constant 0 : index
    %c1_21 = arith.constant 1 : index
    %c0_22 = arith.constant 0 : index
    %c0_23 = arith.constant 0 : index
    %26 = vector.load %arg10[%c0_20, %c1_21, %c0_22, %c0_23] : memref<1x4x8x128xf32, #tpu.memory_space<vmem>>, vector<1x1x8x128xf32>
    %27 = vector.shape_cast %26 : vector<1x1x8x128xf32> to vector<8x128xf32>
    %28 = vector.shape_cast %25 : vector<8x128xf32> to vector<1x1x8x128xf32>
    tpu.vector_store %arg10[%c0_20, %c1_21, %c0_22, %c0_23], %28 {strides = array<i32>} : memref<1x4x8x128xf32, #tpu.memory_space<vmem>>, vector<1x1x8x128xf32>,
    %c0_24 = arith.constant 0 : index
    %c0_25 = arith.constant 0 : index
    %29 = vector.load %arg6[%c0_24, %c0_25] : memref<16x128xf32, #tpu.memory_space<vmem>>, vector<16x128xf32>
    %c0_26 = arith.constant 0 : index
    %c0_27 = arith.constant 0 : index
    %30 = vector.load %arg7[%c0_26, %c0_27] : memref<16x128xf32, #tpu.memory_space<vmem>>, vector<16x128xf32>
    %31 = arith.subf %29, %30 : vector<16x128xf32>
    %32 = arith.subf %29, %30 : vector<16x128xf32>
    %33 = arith.mulf %31, %32 : vector<16x128xf32>
    %c0_28 = arith.constant 0 : index
    %c2 = arith.constant 2 : index
    %c0_29 = arith.constant 0 : index
    %c0_30 = arith.constant 0 : index
    %34 = vector.load %arg10[%c0_28, %c2, %c0_29, %c0_30] : memref<1x4x8x128xf32, #tpu.memory_space<vmem>>, vector<1x1x8x128xf32>
    %35 = vector.shape_cast %34 : vector<1x1x8x128xf32> to vector<8x128xf32>
    %36 = vector.shape_cast %33 : vector<16x128xf32> to vector<2x8x128xf32>
    %cst_31 = arith.constant dense<0.000000e+00> : vector<8x128xf32>
    %37 = vector.multi_reduction <add>, %36, %cst_31 [0] : vector<2x8x128xf32> to vector<8x128xf32>
    %38 = arith.addf %35, %37 : vector<8x128xf32>
    %c0_32 = arith.constant 0 : index
    %c2_33 = arith.constant 2 : index
    %c0_34 = arith.constant 0 : index
    %c0_35 = arith.constant 0 : index
    %39 = vector.load %arg10[%c0_32, %c2_33, %c0_34, %c0_35] : memref<1x4x8x128xf32, #tpu.memory_space<vmem>>, vector<1x1x8x128xf32>
    %40 = vector.shape_cast %39 : vector<1x1x8x128xf32> to vector<8x128xf32>
    %41 = vector.shape_cast %38 : vector<8x128xf32> to vector<1x1x8x128xf32>
    tpu.vector_store %arg10[%c0_32, %c2_33, %c0_34, %c0_35], %41 {strides = array<i32>} : memref<1x4x8x128xf32, #tpu.memory_space<vmem>>, vector<1x1x8x128xf32>,
    %c0_36 = arith.constant 0 : index
    %c0_37 = arith.constant 0 : index
    %42 = vector.load %arg8[%c0_36, %c0_37] : memref<16x128xf32, #tpu.memory_space<vmem>>, vector<16x128xf32>
    %c0_38 = arith.constant 0 : index
    %c0_39 = arith.constant 0 : index
    %43 = vector.load %arg9[%c0_38, %c0_39] : memref<16x128xf32, #tpu.memory_space<vmem>>, vector<16x128xf32>
    %44 = arith.subf %42, %43 : vector<16x128xf32>
    %45 = arith.subf %42, %43 : vector<16x128xf32>
    %46 = arith.mulf %44, %45 : vector<16x128xf32>
    %c0_40 = arith.constant 0 : index
    %c3 = arith.constant 3 : index
    %c0_41 = arith.constant 0 : index
    %c0_42 = arith.constant 0 : index
    %47 = vector.load %arg10[%c0_40, %c3, %c0_41, %c0_42] : memref<1x4x8x128xf32, #tpu.memory_space<vmem>>, vector<1x1x8x128xf32>
    %48 = vector.shape_cast %47 : vector<1x1x8x128xf32> to vector<8x128xf32>
    %49 = vector.shape_cast %46 : vector<16x128xf32> to vector<2x8x128xf32>
    %cst_43 = arith.constant dense<0.000000e+00> : vector<8x128xf32>
    %50 = vector.multi_reduction <add>, %49, %cst_43 [0] : vector<2x8x128xf32> to vector<8x128xf32>
    %51 = arith.addf %48, %50 : vector<8x128xf32>
    %c0_44 = arith.constant 0 : index
    %c3_45 = arith.constant 3 : index
    %c0_46 = arith.constant 0 : index
    %c0_47 = arith.constant 0 : index
    %52 = vector.load %arg10[%c0_44, %c3_45, %c0_46, %c0_47] : memref<1x4x8x128xf32, #tpu.memory_space<vmem>>, vector<1x1x8x128xf32>
    %53 = vector.shape_cast %52 : vector<1x1x8x128xf32> to vector<8x128xf32>
    %54 = vector.shape_cast %51 : vector<8x128xf32> to vector<1x1x8x128xf32>
    tpu.vector_store %arg10[%c0_44, %c3_45, %c0_46, %c0_47], %54 {strides = array<i32>} : memref<1x4x8x128xf32, #tpu.memory_space<vmem>>, vector<1x1x8x128xf32>,
    return
  }
  func.func @transform_0(%arg0: i32, %arg1: i32) -> (i32, i32) {
    %c1_i32 = arith.constant 1 : i32
    %0 = arith.muli %arg0, %c1_i32 : i32
    %1 = arith.addi %0, %arg1 : i32
    %c0_i32 = arith.constant 0 : i32
    %2 = arith.minsi %1, %c0_i32 : i32
    %c0_i32_0 = arith.constant 0 : i32
    %c0_i32_1 = arith.constant 0 : i32
    return %2, %c0_i32_0 : i32, i32
  }
  func.func @transform_1(%arg0: i32, %arg1: i32) -> (i32, i32) {
    %c1_i32 = arith.constant 1 : i32
    %0 = arith.muli %arg0, %c1_i32 : i32
    %1 = arith.addi %0, %arg1 : i32
    %c0_i32 = arith.constant 0 : i32
    %2 = arith.minsi %1, %c0_i32 : i32
    %c0_i32_0 = arith.constant 0 : i32
    %c0_i32_1 = arith.constant 0 : i32
    return %2, %c0_i32_0 : i32, i32
  }
  func.func @transform_2(%arg0: i32, %arg1: i32) -> (i32, i32) {
    %c1_i32 = arith.constant 1 : i32
    %0 = arith.muli %arg0, %c1_i32 : i32
    %1 = arith.addi %0, %arg1 : i32
    %c0_i32 = arith.constant 0 : i32
    %2 = arith.minsi %1, %c0_i32 : i32
    %c0_i32_0 = arith.constant 0 : i32
    %c0_i32_1 = arith.constant 0 : i32
    return %2, %c0_i32_0 : i32, i32
  }
  func.func @transform_3(%arg0: i32, %arg1: i32) -> (i32, i32) {
    %c1_i32 = arith.constant 1 : i32
    %0 = arith.muli %arg0, %c1_i32 : i32
    %1 = arith.addi %0, %arg1 : i32
    %c0_i32 = arith.constant 0 : i32
    %2 = arith.minsi %1, %c0_i32 : i32
    %c0_i32_0 = arith.constant 0 : i32
    %c0_i32_1 = arith.constant 0 : i32
    return %2, %c0_i32_0 : i32, i32
  }
  func.func @transform_4(%arg0: i32, %arg1: i32) -> (i32, i32) {
    %c1_i32 = arith.constant 1 : i32
    %0 = arith.muli %arg0, %c1_i32 : i32
    %1 = arith.addi %0, %arg1 : i32
    %c0_i32 = arith.constant 0 : i32
    %2 = arith.minsi %1, %c0_i32 : i32
    %c0_i32_0 = arith.constant 0 : i32
    %c0_i32_1 = arith.constant 0 : i32
    return %2, %c0_i32_0 : i32, i32
  }
  func.func @transform_5(%arg0: i32, %arg1: i32) -> (i32, i32) {
    %c1_i32 = arith.constant 1 : i32
    %0 = arith.muli %arg0, %c1_i32 : i32
    %1 = arith.addi %0, %arg1 : i32
    %c0_i32 = arith.constant 0 : i32
    %2 = arith.minsi %1, %c0_i32 : i32
    %c0_i32_0 = arith.constant 0 : i32
    %c0_i32_1 = arith.constant 0 : i32
    return %2, %c0_i32_0 : i32, i32
  }
  func.func @transform_6(%arg0: i32, %arg1: i32) -> (i32, i32) {
    %c1_i32 = arith.constant 1 : i32
    %0 = arith.muli %arg0, %c1_i32 : i32
    %1 = arith.addi %0, %arg1 : i32
    %c0_i32 = arith.constant 0 : i32
    %2 = arith.minsi %1, %c0_i32 : i32
    %c0_i32_0 = arith.constant 0 : i32
    %c0_i32_1 = arith.constant 0 : i32
    return %2, %c0_i32_0 : i32, i32
  }
  func.func @transform_7(%arg0: i32, %arg1: i32) -> (i32, i32) {
    %c1_i32 = arith.constant 1 : i32
    %0 = arith.muli %arg0, %c1_i32 : i32
    %1 = arith.addi %0, %arg1 : i32
    %c0_i32 = arith.constant 0 : i32
    %2 = arith.minsi %1, %c0_i32 : i32
    %c0_i32_0 = arith.constant 0 : i32
    %c0_i32_1 = arith.constant 0 : i32
    return %2, %c0_i32_0 : i32, i32
  }
  func.func @transform_8(%arg0: i32, %arg1: i32) -> (i32, i32, i32, i32) {
    %c0_i32 = arith.constant 0 : i32
    %c0_i32_0 = arith.constant 0 : i32
    %c0_i32_1 = arith.constant 0 : i32
    %c0_i32_2 = arith.constant 0 : i32
    return %arg0, %c0_i32, %c0_i32_0, %c0_i32_1 : i32, i32, i32, i32
  }
}

</mosaic_0001>

<bundles_post_ra>
// kernel: multi_head_loss_autotune.1
= control target key start
LH: loop header
LB: loop body
LE: loop exit
PB: predicated region body
PF: predicated region fallthrough
CT: control target
= control target key end

     0   :  { %s508_s0 = inlined_call_operand.vmem [shape: f32[16,128], index: 0, kind: input, shape index: {}]   ;;  %s509_s1 = inlined_call_operand.vmem [shape: f32[16,128], index: 1, kind: input, shape index: {}]   ;;  %s510_s2 = inlined_call_operand.vmem [shape: f32[16,128], index: 2, kind: input, shape index: {}]   ;;  %s511_s3 = inlined_call_operand.vmem [shape: f32[16,128], index: 3, kind: input, shape index: {}]   ;;  %s512_s4 = inlined_call_operand.vmem [shape: f32[16,128], index: 4, kind: input, shape index: {}]   ;;  %s513_s5 = inlined_call_operand.vmem [shape: f32[16,128], index: 5, kind: input, shape index: {}]   ;;  %s514_s6 = inlined_call_operand.vmem [shape: f32[16,128], index: 6, kind: input, shape index: {}]   ;;  %s515_s7 = inlined_call_operand.vmem [shape: f32[16,128], index: 7, kind: input, shape index: {}]   ;;  %s516_s8 = inlined_call_operand.vmem [shape: f32[1,4,8,128], index: 8, kind: output, shape index: {}]  }
   0x1   :  { %v293_v0 = vld [vmem:[%s508_s0] sm:$0xff]  ;;  %v294_v1 = vld [vmem:[%s508_s0 + $0x8] sm:$0xff] }
   0x2   :  { %v295_v2 = vld [vmem:[%s509_s1] sm:$0xff]  ;;  %v296_v3 = vld [vmem:[%s509_s1 + $0x8] sm:$0xff] }
   0x3   :  { %v297_v4 = vsub.f32 %v293_v0, %v295_v2  ;;  %v305_v5 = vld [vmem:[%s510_s2] sm:$0xff]  ;;  %v306_v6 = vld [vmem:[%s510_s2 + $0x8] sm:$0xff]  ;;  %v298_v7 = vsub.f32 %v294_v1, %v296_v3 }
   0x4   :  { %v307_v8 = vld [vmem:[%s511_s3] sm:$0xff]  ;;  %v308_v9 = vld [vmem:[%s511_s3 + $0x8] sm:$0xff] }
   0x5   :  { %v318_v10 = vld [vmem:[%s512_s4] sm:$0xff]  ;;  %v299_v11 = vmul.f32 %v297_v4, %v297_v4  ;;  %v309_v12 = vsub.f32 %v305_v5, %v307_v8  ;;  %v310_v13 = vsub.f32 %v306_v6, %v308_v9  ;;  %v319_v14 = vld [vmem:[%s512_s4 + $0x8] sm:$0xff]  ;;  %v300_v17 = vmul.f32 %v298_v7, %v298_v7 }
   0x6   :  { %v320_v15 = vld [vmem:[%s513_s5] sm:$0xff]  ;;  %v321_v16 = vld [vmem:[%s513_s5 + $0x8] sm:$0xff] }
   0x7   :  { %v322_v18 = vsub.f32 %v318_v10, %v320_v15  ;;  %v323_v19 = vsub.f32 %v319_v14, %v321_v16  ;;  %v331_v20 = vld [vmem:[%s514_s6] sm:$0xff]  ;;  %v332_v21 = vld [vmem:[%s514_s6 + $0x8] sm:$0xff]  ;;  %v311_v23 = vmul.f32 %v309_v12, %v309_v12  ;;  %v312_v24 = vmul.f32 %v310_v13, %v310_v13 }
   0x8   :  { %v333_v22 = vld [vmem:[%s515_s7] sm:$0xff]  ;;  %v334_v25 = vld [vmem:[%s515_s7 + $0x8] sm:$0xff]  ;;  %v302_v27 = vadd.f32 %v300_v17, %v299_v11 }
   0x9   :  { %v335_v26 = vsub.f32 %v331_v20, %v333_v22  ;;  %v324_v28 = vmul.f32 %v322_v18, %v322_v18  ;;  %v325_v29 = vmul.f32 %v323_v19, %v323_v19  ;;  %v336_v30 = vsub.f32 %v332_v21, %v334_v25 }
   0xa   :  { %v315_v31 = vadd.f32 %v312_v24, %v311_v23  ;;  %304 = vst [vmem:[%s516_s8] sm:$0xff] %v302_v27 }
   0xb   :  { %v337_v32 = vmul.f32 %v335_v26, %v335_v26  ;;  %v328_v33 = vadd.f32 %v325_v29, %v324_v28  ;;  %v338_v34 = vmul.f32 %v336_v30, %v336_v30 }
   0xc   :  { %397 = vst [vmem:[%s516_s8 + $0x8] sm:$0xff] %v315_v31 }
   0xd   :  { %v341_v35 = vadd.f32 %v338_v34, %v337_v32  ;;  %399 = vst [vmem:[%s516_s8 + $0x10] sm:$0xff] %v328_v33 }
   0xf   :  { %401 = vst [vmem:[%s516_s8 + $0x18] sm:$0xff] %v341_v35 }

</bundles_post_ra>
